<compile_context>
chip_gen: v5e
topology: v5e:2x2
jax: 0.10.0
libtpu: 0.0.40
codegen_flags: <defaults>
</compile_context>

<pallas_src>
import functools

import jax
import jax.numpy as jnp
from jax.experimental import pallas as pl
from jax.experimental.pallas import tpu as pltpu


def channel_attention_kernel(x_ref, w1t_ref, b1_ref, w2_ref, b2_ref, o_ref,
                             acc_ref, *, inv_hw):
    # x_ref:   (TB, C, THW)  current (batch-block, spatial-tile), C on sublanes
    # w1t_ref: (C, Cr)       first 1x1 conv weight, pre-transposed (w1.T)
    # b1_ref:  (1, Cr)
    # w2_ref:  (C, Cr)       second 1x1 conv weight (PyTorch layout)
    # b2_ref:  (C, 1)
    # o_ref:   (TB, C, 1)
    # acc_ref: (TB, C, 1) f32 running spatial sum for the current batch block
    k = pl.program_id(1)

    @pl.when(k == 0)
    def _init():
        acc_ref[...] = jnp.zeros_like(acc_ref)

    # Partial global-average-pool: reduce this spatial tile over the lane axis.
    x = x_ref[...]                                                  # (TB, C, THW)
    acc_ref[...] += jnp.sum(x, axis=-1, keepdims=True, dtype=jnp.float32)

    @pl.when(k == pl.num_programs(1) - 1)
    def _finalize():
        tb = acc_ref.shape[0]  # static
        gap = acc_ref[...] * inv_hw                                 # (TB, C, 1) f32
        # Tiny per-image MLP kept on VPU/XLU (broadcast-mul + reduce), unrolled
        # over the (small, static) batch fold.  No MXU for C=32/Cr=4 shapes.
        for t in range(tb):
            g = gap[t]                                              # (C, 1)
            # h = ReLU(gap @ w1.T + b1): broadcast-mul + sublane reduce.
            h = jnp.sum(w1t_ref[...] * g, axis=0, keepdims=True) + b1_ref[...]  # (1, Cr)
            h = jnp.maximum(h, 0.0)
            # out = h @ w2.T + b2: broadcast-mul + lane reduce.
            out = jnp.sum(w2_ref[...] * h, axis=-1, keepdims=True) + b2_ref[...]  # (C, 1)
            o_ref[t] = out.astype(o_ref.dtype)


def _round_up(x, m):
    return -(-x // m) * m


def _pick_tiles(batch, c, hw, itemsize, max_tile_bytes):
    """Choose (batch_fold, spatial_tile, padded_hw, n_hw_tiles)."""
    hw_lane = _round_up(hw, 128)                       # lane-align the spatial axis
    budget_lanes = max(128, (max_tile_bytes // (c * itemsize)) // 128 * 128)
    thw = min(hw_lane, budget_lanes)
    hw_padded = _round_up(hw_lane, thw)
    n_hw = hw_padded // thw

    # Fold batch elements into one block when a whole image fits in one tile,
    # but keep >= 2 batch blocks (megacore) when B >= 2, and cap the fold.
    tb = 1
    if n_hw == 1 and batch > 1:
        tb_max = max(1, budget_lanes // hw_padded)
        tb_cap = max(1, batch // 2)
        tb = min(tb_max, tb_cap, batch, 8)
        while batch % tb != 0:
            tb -= 1
    return tb, thw, hw_padded, n_hw


def channel_attention(x_nchw, w1, b1, w2, b2, *, max_tile_bytes=8 * 1024 * 1024):
    """x_nchw: (B, C, H, W); w1: (Cr, C); b1: (Cr,); w2: (C, Cr); b2: (C,).

    Returns (B, C, 1, 1) matching PyTorch ChannelAttention.forward.
    """
    B, C, H, W = x_nchw.shape
    Cr = w1.shape[0]
    HW = H * W
    itemsize = jnp.dtype(x_nchw.dtype).itemsize

    tb, thw, hw_padded, n_hw = _pick_tiles(B, C, HW, itemsize, max_tile_bytes)

    # Free reshape: channels on sublanes, spatial on lanes.  No transpose.
    x = x_nchw.reshape(B, C, HW)
    if hw_padded != HW:
        # Zero padding doesn't change the spatial sum; inv_hw uses the true HW.
        x = jnp.pad(x, ((0, 0), (0, 0), (0, hw_padded - HW)))

    w1t = w1.T                      # (C, Cr)
    b1r = b1.reshape(1, Cr)
    b2c = b2.reshape(C, 1)

    kernel = functools.partial(channel_attention_kernel, inv_hw=1.0 / HW)

    w_itemsize = jnp.dtype(w1.dtype).itemsize
    cost = pl.CostEstimate(
        flops=int(B * C * HW + 4 * B * C * Cr),
        transcendentals=0,
        bytes_accessed=int(B * C * hw_padded * itemsize
                           + B * C * itemsize
                           + (2 * C * Cr + Cr + C) * w_itemsize),
    )

    out = pl.pallas_call(
        kernel,
        out_shape=jax.ShapeDtypeStruct((B, C, 1), x.dtype),
        grid_spec=pltpu.PrefetchScalarGridSpec(
            num_scalar_prefetch=0,
            grid=(B // tb, n_hw),
            in_specs=[
                pl.BlockSpec((tb, C, thw), lambda b, k: (b, 0, k)),
                pl.BlockSpec((C, Cr), lambda b, k: (0, 0)),
                pl.BlockSpec((1, Cr), lambda b, k: (0, 0)),
                pl.BlockSpec((C, Cr), lambda b, k: (0, 0)),
                pl.BlockSpec((C, 1), lambda b, k: (0, 0)),
            ],
            out_specs=pl.BlockSpec((tb, C, 1), lambda b, k: (b, 0, 0)),
            scratch_shapes=[pltpu.VMEM((tb, C, 1), jnp.float32)],
        ),
        compiler_params=pltpu.CompilerParams(
            dimension_semantics=("parallel", "arbitrary"),
            vmem_limit_bytes=32 * 1024 * 1024),
        cost_estimate=cost,
    )(x, w1t, b1r, w2, b2c)

    # (B, C, 1) -> NCHW (B, C, 1, 1); free reshape.
    return out.reshape(B, C, 1, 1)


def reference(x_nchw, w1, b1, w2, b2):
    # Pure-JAX reference of the PyTorch ChannelAttention module.
    gap = jnp.mean(x_nchw.astype(jnp.float32), axis=(2, 3))          # (B, C)
    h = jnp.maximum(gap @ w1.T + b1, 0.0)                             # (B, Cr)
    out = h @ w2.T + b2                                               # (B, C)
    return out.reshape(*out.shape, 1, 1).astype(x_nchw.dtype)


def _run_case(key, B, C, H, W, reduction):
    Cr = C // reduction
    kx, k1, k2, k3, k4 = jax.random.split(key, 5)

    x = jax.random.normal(kx, (B, C, H, W), dtype=jnp.float32)

    # Deterministic parameter init (PyTorch Conv2d-style uniform bounds).
    bound1 = 1.0 / (C ** 0.5)
    bound2 = 1.0 / (Cr ** 0.5)
    w1 = jax.random.uniform(k1, (Cr, C), jnp.float32, -bound1, bound1)   # conv1 1x1 weight
    b1 = jax.random.uniform(k2, (Cr,), jnp.float32, -bound1, bound1)
    w2 = jax.random.uniform(k3, (C, Cr), jnp.float32, -bound2, bound2)   # conv2 1x1 weight
    b2 = jax.random.uniform(k4, (C,), jnp.float32, -bound2, bound2)

    out = channel_attention(x, w1, b1, w2, b2)
    out = jax.block_until_ready(out)

    ref = reference(x, w1, b1, w2, b2)
    assert out.shape == (B, C, 1, 1), out.shape
    err = float(jnp.max(jnp.abs(out - ref)))
    assert jnp.allclose(out, ref, atol=1e-5, rtol=1e-5), err


if __name__ == "__main__":
    root = jax.random.PRNGKey(0)
    # Primary small shape (MyUNet dim=32, reduction=8): batch=2, 16x16 maps.
    _run_case(jax.random.fold_in(root, 0), B=2, C=32, H=16, W=16, reduction=8)
    # Exercises the batch-fold path (TB > 1) on tiny maps.
    _run_case(jax.random.fold_in(root, 1), B=8, C=32, H=8, W=8, reduction=8)
    # Exercises the non-128-divisible-HW zero-padding path.
    _run_case(jax.random.fold_in(root, 2), B=2, C=32, H=10, W=10, reduction=8)
    print("KERNEL_OK")
</pallas_src>

<mosaic_0001>
module attributes {stable_mosaic.version = 11 : i64} {
  func.func @channel_attention_kernel(%arg0: i32, %arg1: i32, %arg2: memref<1x32x256xf32, #tpu.memory_space<vmem>>, %arg3: memref<32x4xf32, #tpu.memory_space<vmem>>, %arg4: memref<1x4xf32, #tpu.memory_space<vmem>>, %arg5: memref<32x4xf32, #tpu.memory_space<vmem>>, %arg6: memref<32x1xf32, #tpu.memory_space<vmem>>, %arg7: memref<1x32x1xf32, #tpu.memory_space<vmem>>, %arg8: memref<1x32x1xf32, #tpu.memory_space<vmem>>) attributes {dimension_semantics = [#tpu.dimension_semantics<parallel>, #tpu.dimension_semantics<arbitrary>], iteration_bounds = array<i64: 2, 1>, scalar_prefetch = 0 : i64, scratch_operands = 1 : i64, tpu.core_type = #tpu.core_type<tc>, window_params = [{transform_indices = @transform_0, window_bounds = array<i64: 1, 32, 256>}, {pipeline_mode = #tpu.pipeline_mode<synchronous>, transform_indices = @transform_1, window_bounds = array<i64: 32, 4>}, {pipeline_mode = #tpu.pipeline_mode<synchronous>, transform_indices = @transform_2, window_bounds = array<i64: 1, 4>}, {pipeline_mode = #tpu.pipeline_mode<synchronous>, transform_indices = @transform_3, window_bounds = array<i64: 32, 4>}, {pipeline_mode = #tpu.pipeline_mode<synchronous>, transform_indices = @transform_4, window_bounds = array<i64: 32, 1>}, {transform_indices = @transform_5, window_bounds = array<i64: 1, 32, 1>}]} {
    %c0_i32 = arith.constant 0 : i32
    %0 = arith.cmpi eq, %arg1, %c0_i32 : i32
    %1 = arith.extui %0 : i1 to i32
    %c0_i32_0 = arith.constant 0 : i32
    %2 = arith.cmpi ne, %1, %c0_i32_0 : i32
    scf.if %2 {
      %cst_11 = arith.constant 0.000000e+00 : f32
      %12 = vector.broadcast %cst_11 : f32 to vector<1x32x1xf32>
      %c0_12 = arith.constant 0 : index
      %c0_13 = arith.constant 0 : index
      %c0_14 = arith.constant 0 : index
      %13 = vector.load %arg8[%c0_12, %c0_13, %c0_14] : memref<1x32x1xf32, #tpu.memory_space<vmem>>, vector<1x32x1xf32>
      tpu.vector_store %arg8[%c0_12, %c0_13, %c0_14], %12 {strides = array<i32>} : memref<1x32x1xf32, #tpu.memory_space<vmem>>, vector<1x32x1xf32>,
    } else {
    }
    %c0 = arith.constant 0 : index
    %c0_1 = arith.constant 0 : index
    %c0_2 = arith.constant 0 : index
    %3 = vector.load %arg2[%c0, %c0_1, %c0_2] : memref<1x32x256xf32, #tpu.memory_space<vmem>>, vector<1x32x256xf32>
    %c0_3 = arith.constant 0 : index
    %c0_4 = arith.constant 0 : index
    %c0_5 = arith.constant 0 : index
    %4 = vector.load %arg8[%c0_3, %c0_4, %c0_5] : memref<1x32x1xf32, #tpu.memory_space<vmem>>, vector<1x32x1xf32>
    %cst = arith.constant dense<0.000000e+00> : vector<1x32xf32>
    %5 = vector.multi_reduction <add>, %3, %cst [2] : vector<1x32x256xf32> to vector<1x32xf32>
    %6 = vector.shape_cast %5 : vector<1x32xf32> to vector<1x32x1xf32>
    %7 = arith.addf %4, %6 : vector<1x32x1xf32>
    %c0_6 = arith.constant 0 : index
    %c0_7 = arith.constant 0 : index
    %c0_8 = arith.constant 0 : index
    %8 = vector.load %arg8[%c0_6, %c0_7, %c0_8] : memref<1x32x1xf32, #tpu.memory_space<vmem>>, vector<1x32x1xf32>
    tpu.vector_store %arg8[%c0_6, %c0_7, %c0_8], %7 {strides = array<i32>} : memref<1x32x1xf32, #tpu.memory_space<vmem>>, vector<1x32x1xf32>,
    %c0_i32_9 = arith.constant 0 : i32
    %9 = arith.cmpi eq, %arg1, %c0_i32_9 : i32
    %10 = arith.extui %9 : i1 to i32
    %c0_i32_10 = arith.constant 0 : i32
    %11 = arith.cmpi ne, %10, %c0_i32_10 : i32
    scf.if %11 {
      %c0_11 = arith.constant 0 : index
      %c0_12 = arith.constant 0 : index
      %c0_13 = arith.constant 0 : index
      %12 = vector.load %arg8[%c0_11, %c0_12, %c0_13] : memref<1x32x1xf32, #tpu.memory_space<vmem>>, vector<1x32x1xf32>
      %cst_14 = arith.constant 3.906250e-03 : f32
      %13 = vector.broadcast %cst_14 : f32 to vector<1x32x1xf32>
      %14 = arith.mulf %12, %13 : vector<1x32x1xf32>
      %15 = vector.shape_cast %14 : vector<1x32x1xf32> to vector<32x1xf32>
      %c0_15 = arith.constant 0 : index
      %c0_16 = arith.constant 0 : index
      %16 = vector.load %arg3[%c0_15, %c0_16] : memref<32x4xf32, #tpu.memory_space<vmem>>, vector<32x4xf32>
      %17 = vector.broadcast %15 : vector<32x1xf32> to vector<32x4xf32>
      %18 = arith.mulf %16, %17 : vector<32x4xf32>
      %cst_17 = arith.constant dense<0.000000e+00> : vector<4xf32>
      %19 = vector.multi_reduction <add>, %18, %cst_17 [0] : vector<32x4xf32> to vector<4xf32>
      %20 = vector.shape_cast %19 : vector<4xf32> to vector<1x4xf32>
      %c0_18 = arith.constant 0 : index
      %c0_19 = arith.constant 0 : index
      %21 = vector.load %arg4[%c0_18, %c0_19] : memref<1x4xf32, #tpu.memory_space<vmem>>, vector<1x4xf32>
      %22 = arith.addf %20, %21 : vector<1x4xf32>
      %cst_20 = arith.constant 0.000000e+00 : f32
      %23 = vector.broadcast %cst_20 : f32 to vector<1x4xf32>
      %24 = arith.maximumf %22, %23 : vector<1x4xf32>
      %c0_21 = arith.constant 0 : index
      %c0_22 = arith.constant 0 : index
      %25 = vector.load %arg5[%c0_21, %c0_22] : memref<32x4xf32, #tpu.memory_space<vmem>>, vector<32x4xf32>
      %26 = vector.broadcast %24 : vector<1x4xf32> to vector<32x4xf32>
      %27 = arith.mulf %25, %26 : vector<32x4xf32>
      %cst_23 = arith.constant dense<0.000000e+00> : vector<32xf32>
      %28 = vector.multi_reduction <add>, %27, %cst_23 [1] : vector<32x4xf32> to vector<32xf32>
      %29 = vector.shape_cast %28 : vector<32xf32> to vector<32x1xf32>
      %c0_24 = arith.constant 0 : index
      %c0_25 = arith.constant 0 : index
      %30 = vector.load %arg6[%c0_24, %c0_25] : memref<32x1xf32, #tpu.memory_space<vmem>>, vector<32x1xf32>
      %31 = arith.addf %29, %30 : vector<32x1xf32>
      %c0_26 = arith.constant 0 : index
      %c0_27 = arith.constant 0 : index
      %c0_28 = arith.constant 0 : index
      %32 = vector.load %arg7[%c0_26, %c0_27, %c0_28] : memref<1x32x1xf32, #tpu.memory_space<vmem>>, vector<1x32x1xf32>
      %33 = vector.shape_cast %32 : vector<1x32x1xf32> to vector<32x1xf32>
      %34 = vector.shape_cast %31 : vector<32x1xf32> to vector<1x32x1xf32>
      tpu.vector_store %arg7[%c0_26, %c0_27, %c0_28], %34 {strides = array<i32>} : memref<1x32x1xf32, #tpu.memory_space<vmem>>, vector<1x32x1xf32>,
    } else {
    }
    return
  }
  func.func @transform_0(%arg0: i32, %arg1: i32) -> (i32, i32, i32) {
    %c0_i32 = arith.constant 0 : i32
    %c0_i32_0 = arith.constant 0 : i32
    return %arg0, %c0_i32, %arg1 : i32, i32, i32
  }
  func.func @transform_1(%arg0: i32, %arg1: i32) -> (i32, i32) {
    %c0_i32 = arith.constant 0 : i32
    %c0_i32_0 = arith.constant 0 : i32
    %c0_i32_1 = arith.constant 0 : i32
    return %c0_i32, %c0_i32_0 : i32, i32
  }
  func.func @transform_2(%arg0: i32, %arg1: i32) -> (i32, i32) {
    %c0_i32 = arith.constant 0 : i32
    %c0_i32_0 = arith.constant 0 : i32
    %c0_i32_1 = arith.constant 0 : i32
    return %c0_i32, %c0_i32_0 : i32, i32
  }
  func.func @transform_3(%arg0: i32, %arg1: i32) -> (i32, i32) {
    %c0_i32 = arith.constant 0 : i32
    %c0_i32_0 = arith.constant 0 : i32
    %c0_i32_1 = arith.constant 0 : i32
    return %c0_i32, %c0_i32_0 : i32, i32
  }
  func.func @transform_4(%arg0: i32, %arg1: i32) -> (i32, i32) {
    %c0_i32 = arith.constant 0 : i32
    %c0_i32_0 = arith.constant 0 : i32
    %c0_i32_1 = arith.constant 0 : i32
    return %c0_i32, %c0_i32_0 : i32, i32
  }
  func.func @transform_5(%arg0: i32, %arg1: i32) -> (i32, i32, i32) {
    %c0_i32 = arith.constant 0 : i32
    %c0_i32_0 = arith.constant 0 : i32
    %c0_i32_1 = arith.constant 0 : i32
    return %arg0, %c0_i32, %c0_i32_0 : i32, i32, i32
  }
}

</mosaic_0001>

<bundles_post_ra>
// kernel: tpu_custom_call.1
= control target key start
LH: loop header
LB: loop body
LE: loop exit
PB: predicated region body
PF: predicated region fallthrough
CT: control target
= control target key end

     0   :  { %10 = vsyncpa [#allocation4], 0  ;;  %s813_s0 = inlined_call_operand.hbm [shape: f32[2,32,256], index: 0, kind: input, shape index: {}]   ;;  %s814_s1 = inlined_call_operand.vmem [shape: f32[32,4], index: 1, kind: input, shape index: {}]   ;;  %s815_s2 = inlined_call_operand.vmem [shape: f32[1,4], index: 2, kind: input, shape index: {}]   ;;  %s816_s3 = inlined_call_operand.vmem [shape: f32[32,4], index: 3, kind: input, shape index: {}]   ;;  %s817_s4 = inlined_call_operand.vmem [shape: f32[32,1], index: 4, kind: input, shape index: {}]   ;;  %s818_s5 = inlined_call_operand.vmem [shape: f32[2,32,1], index: 5, kind: output, shape index: {}]  }
   0x1   :  { %12 = vsyncpa [#allocation4 + $0x1], 0  ;;  %s666_s18 = smov 0   ;;  %s668_s19 = smov 0  }
   0x2   :  { %s670_s20 = smov 0   ;;  %s672_s21 = smov 0  }
   0x3   :  { %s674_s22 = smov 0   ;;  %s676_s23 = smov 0  }
   0x4 LB: > { %s473_s24 = sadd.s32 4294967295, %s630_s23   ;;  %s30_s25 = sadd.s32 1, %s626_s22  ;;  %s630_s23 = sphi %s676_s23, %s18_s23   ;;  %s626_s22 = sphi %s674_s22, %s825_s22   ;;  %s622_s21 = sphi %s672_s21, %s824_s21   ;;  %s618_s20 = sphi %s670_s20, %s823_s20   ;;  %s614_s19 = sphi %s668_s19, %s822_s19   ;;  %s610_s18 = sphi %s666_s18, %s821_s18  }
   0x5   : > { %p32_p0 = scmp.ge.s32.totalorder %s30_s25, 2  ;;  %s39_s26 = sadd.s32 1, %s618_s20 }
   0x6   : > { %p46_p1 = scmp.ne.s32.totalorder %s618_s20, %s614_s19  ;;  %p47_p2 = scmp.eq.s32.totalorder %s630_s23, 0 }
   0x7   : > { %s827_s25 = smov (%p32_p0, %s30_s25), 0  ;;  %p52_p4 = scmp.ne.s32.totalorder %s614_s19, %s610_s18 }
   0x8   : > { %p702_p3 = por %p47_p2, %p46_p1  ;;  %s34_s28 = ssub.s32 %s626_s22, %s827_s25 }
   0x9   : > { %p53_p5 = scmp.eq.s32.totalorder %s473_s24, 0  ;;  %p37_p6 = scmp.eq.s32.totalorder %s34_s28, 0 }
   0xa   : > { %p494_p8 = scmp.lt.s32.totalorder %s630_s23, 2  ;;  %s198_s6 = sand.u32 1, %s618_s20  }
   0xb   : > { %p709_p7 = por %p53_p5, %p52_p4  ;;  %s486_s7 = sshll.u32 %s626_s22, 6 }
   0xc   : > { %s715_s30 = scalar_select %p37_p6, %s618_s20, %s39_s26  }
   0xd   : > { %s477_s8 = sshll.u32 %s198_s6, 6  ;;  %s209_s11 = scalar_lea.hbm %s813_s0, %s486_s7 }
   0xe   : > { %s210_s12 = sshll.u32 %s209_s11, 4  ;;  %s202_s13 = scalar_lea.vmem [#allocation3], %s477_s8  ;;  %s211_s12 = int_to_ptr.hbm [resolvable:$true] %s210_s12 }
   0xf   : > { %s212_s14 = sshll.u32 %s202_s13, 4  ;;  %p491_p9 = pnand %p494_p8, %p702_p3  ;;  %s213_s14 = int_to_ptr.vmem [resolvable:$true] %s212_s14 }
  0x10   : > { %p480_p10 = scmp.ge.s32.totalorder %s630_s23, 1  ;;  %p220_p11 = scmp.lt.s32.totalorder %s630_s23, 3 }
  0x11   : > { %s199_s15 = scalar_lea.sflag [#allocation4], %s198_s6  ;;  %s632_s16 = smov 256  }
  0x12   : > { %s633_s17 = smov 16   ;;  %p221_p12 = pnand %p480_p10, %p220_p11 }
  0x13   : > { %493 = dma.hbm_to_vmem [thread:$0]  (!%p491_p9), %s211_s12, 1024, %s213_s14, %s199_s15, %s632_s16, %s632_s16, %s633_s17  }
  0x14   : > { %224 = sbr.rel (%p221_p12) target bundleno = 434 (0x1b2), region = 40  ;;  %s226_s18 = sand.u32 (!%p221_p12), 1, %s614_s19  }
  0x15   : > { %s481_s24 = sshll.u32 (!%p221_p12), %s226_s18, 6  ;;  %s227_s26 = scalar_lea.sflag (!%p221_p12), [#allocation4], %s226_s18 }
  0x16   : > { %s230_s28 = scalar_lea.vmem (!%p221_p12), [#allocation3], %s481_s24 }
  0x19   : > { %605 = dma.done.wait (%p709_p7), %s227_s26, 1024  }
  0x1a   : > { %607 = vsyncadd (%p709_p7), %s227_s26, 4294966272  ;;  %vm268_vm0 = vcmask 7168   ;;  %v634_v0 = vmov 0.0   ;;  %v277_v1 = vld [vmem:[%s230_s28 + $0x20] sm:$0xff]  ;;  %v278_v2 = vld [vmem:[%s230_s28 + $0x28] sm:$0xff]  ;;  %v635_v13 = vmov 0  }
  0x1b   : > { %271 = vst.msk [vmem:[#allocation2 + $0x10] sm:$0xff] %vm268_vm0, %v634_v0  ;;  %v291_v3 = vadd.f32 %v278_v2, %v277_v1  ;;  %v273_v4 = vld [vmem:[%s230_s28] sm:$0xff]  ;;  %v274_v5 = vld [vmem:[%s230_s28 + $0x8] sm:$0xff]  ;;  %v279_v7 = vld [vmem:[%s230_s28 + $0x30] sm:$0xff]  ;;  %548 = vset.pattern.permute.xlu0 %v635_v13  ;;  %549 = vset.pattern.permute.xlu1 %v635_v13  ;;  %vm345_vm1 = vcmask 31744   ;;  %p259_p13 = scmp.lt.s32.totalorder %s622_s21, 1 }
  0x1c   : > { %269 = vst.msk [vmem:[#allocation2] sm:$0xff] %vm268_vm0, %v634_v0  ;;  %v285_v6 = vadd.f32 %v274_v5, %v273_v4  ;;  %v280_v8 = vld [vmem:[%s230_s28 + $0x38] sm:$0xff]  ;;  %v275_v9 = vld [vmem:[%s230_s28 + $0x10] sm:$0xff]  ;;  %547 = vset.pattern.permute.xlu2 %v635_v13  ;;  %v317_v35 = vld [vmem:[%s814_s1] sm:$0xff] }
  0x1d   : > { %270 = vst.msk [vmem:[#allocation2 + $0x8] sm:$0xff] %vm268_vm0, %v634_v0  ;;  %292 = vadd.xlane.f32.xlu1 %v291_v3  ;;  %v276_v10 = vld [vmem:[%s230_s28 + $0x18] sm:$0xff]  ;;  %v294_v11 = vadd.f32 %v280_v8, %v279_v7  ;;  %v318_v36 = vld [vmem:[%s814_s1 + $0x8] sm:$0xff]  ;;  %v319_v38 = vld [vmem:[%s814_s1 + $0x10] sm:$0xff]  ;;  %s829_s21 = smov (!%p259_p13, %s622_s21), 1 }
  0x1e   : > { %272 = vst.msk [vmem:[#allocation2 + $0x18] sm:$0xff] %vm268_vm0, %v634_v0  ;;  %286 = vadd.xlane.f32.xlu0 %v285_v6  ;;  %v288_v12 = vadd.f32 %v276_v10, %v275_v9  ;;  %v320_v45 = vld [vmem:[%s814_s1 + $0x18] sm:$0xff]  ;;  %v359_v58 = vld [vmem:[%s815_s2] sm:$0x1]  ;;  %v364_v62 = vld [vmem:[%s816_s3 + $0x10] sm:$0xff]  ;;  %s487_s27 = sshll.u32 %s829_s21, 5 }
  0x1f   : > { %v363_v63 = vld [vmem:[%s816_s3 + $0x8] sm:$0xff]  ;;  %v362_v0 = vld [vmem:[%s816_s3] sm:$0xff]  ;;  %v365_v8 = vld [vmem:[%s816_s3 + $0x18] sm:$0xff]  ;;  %s263_s13 = scalar_lea.vmem %s818_s5, %s487_s27 }
  0x20   : > { %v383_v13 = vld [vmem:[%s817_s4] sm:$0xff] }
  0x22   : > { %v283_v14 = vld [vmem:[#allocation2 + $0x10] sm:$0xff] }
  0x23   : > { %v281_v15 = vld [vmem:[#allocation2] sm:$0xff] }
  0x24   : > { %v282_v21 = vld [vmem:[#allocation2 + $0x8] sm:$0xff] }
  0x25   : > { %295 = vadd.xlane.f32.xlu1 %v294_v11  ;;  %v284_v20 = vld [vmem:[#allocation2 + $0x18] sm:$0xff]  ;;  %v385_v11 = vld [vmem:[%s817_s4 + $0x10] sm:$0xff] }
  0x26   : > { %289 = vadd.xlane.f32.xlu0 %v288_v12  ;;  %v384_v12 = vld [vmem:[%s817_s4 + $0x8] sm:$0xff] }
  0x90   : > { %v293_v16 = vpop.xlane.xlu1 %292 }
  0x91   : > { %v299_v17 = vadd.f32 %v293_v16, %v283_v14  ;;  %v287_v18 = vpop.xlane.xlu0 %286 }
  0x92   : > { %v297_v19 = vadd.f32 %v287_v18, %v281_v15 }
  0x93   : > { %304 = vst.msk [vmem:[#allocation2 + $0x10] sm:$0xff] %vm268_vm0, %v299_v17 }
  0x94   : > { %302 = vst.msk [vmem:[#allocation2] sm:$0xff] %vm268_vm0, %v297_v19 }
  0x98   : > { %v296_v22 = vpop.xlane.xlu1 %295 }
  0x99   : > { %v300_v23 = vadd.f32 %v296_v22, %v284_v20  ;;  %v290_v24 = vpop.xlane.xlu0 %289  ;;  %v386_v20 = vld [vmem:[%s817_s4 + $0x18] sm:$0xff] }
  0x9a   : > { %v311_v25 = vld [vmem:[#allocation2 + $0x10] sm:$0xff]  ;;  %v298_v26 = vadd.f32 %v290_v24, %v282_v21 }
  0x9b   : > { %305 = vst.msk [vmem:[#allocation2 + $0x18] sm:$0xff] %vm268_vm0, %v300_v23  ;;  %v315_v27 = vmul.f32 0.00390625, %v311_v25  ;;  %v309_v28 = vld [vmem:[#allocation2] sm:$0xff] }
  0x9c   : > { %303 = vst.msk [vmem:[#allocation2 + $0x8] sm:$0xff] %vm268_vm0, %v298_v26  ;;  %v313_v29 = vmul.f32 0.00390625, %v309_v28 }
  0x9d   : > { %333 = vperm.xlu0 %548, %v315_v27  }
  0x9e   : > { %323 = vperm.xlu2 %547, %v313_v29  }
  0xa2   : > { %v312_v30 = vld [vmem:[#allocation2 + $0x18] sm:$0xff] }
  0xa3   : > { %v316_v31 = vmul.f32 0.00390625, %v312_v30  ;;  %v310_v32 = vld [vmem:[#allocation2 + $0x8] sm:$0xff] }
  0xa4   : > { %v314_v33 = vmul.f32 0.00390625, %v310_v32 }
  0xa5   : > { %338 = vperm.xlu1 %549, %v316_v31  }
  0xa6   : > { %328 = vperm.xlu2 %547, %v314_v33  }
  0xf8   : > { %v324_v34 = vpop.permute.xlu2 %323 }
  0xf9   : > { %v341_v40 = vmul.f32 %v324_v34, %v317_v35 }
  0xfb   : > { %v346_v43 = vsel %vm345_vm1, %v341_v40, 0.0 }
 0x100   : > { %v329_v37 = vpop.permute.xlu2 %328 }
 0x101   : > { %v342_v41 = vmul.f32 %v329_v37, %v318_v36 }
 0x103   : > { %v347_v44 = vsel %vm345_vm1, %v342_v41, 0.0 }
 0x104   : > { %v348_v47 = vadd.f32 %v347_v44, %v346_v43 }
 0x10f   : > { %v334_v39 = vpop.permute.xlu0 %333 }
 0x110   : > { %v343_v42 = vmul.f32 %v334_v39, %v319_v38 }
 0x112   : > { %v349_v46 = vsel %vm345_vm1, %v343_v42, 0.0 }
 0x113   : > { %v350_v50 = vadd.f32 %v349_v46, %v348_v47 }
 0x117   : > { %v339_v48 = vpop.permute.xlu1 %338 }
 0x118   : > { %v344_v49 = vmul.f32 %v339_v48, %v320_v45 }
 0x11a   : > { %v351_v51 = vsel %vm345_vm1, %v344_v49, 0.0 }
 0x11b   : > { %v352_v52 = vadd.f32 %v351_v51, %v350_v50 }
 0x11d   : > { %v353_v53 = vrot.slane %v352_v52, 4 }
 0x11f   : > { %v354_v54 = vadd.f32 %v353_v53, %v352_v52 }
 0x121   : > { %v355_v55 = vrot.slane %v354_v54, 2 }
 0x123   : > { %v356_v56 = vadd.f32 %v355_v55, %v354_v54 }
 0x125   : > { %v357_v57 = vrot.slane %v356_v56, 1 }
 0x127   : > { %v358_v59 = vadd.f32 %v357_v57, %v356_v56 }
 0x129   : > { %v360_v60 = vadd.f32 %v359_v58, %v358_v59 }
 0x12b   : > { %v361_v61 = vmax.f32 %v360_v60, 0.0 }
 0x12d   : > { %v366_v1 = vperm.slane %v361_v61, 0 }
 0x12f   : > { %v369_v2 = vmul.f32 %v366_v1, %v364_v62  ;;  %v368_v3 = vmul.f32 %v366_v1, %v363_v63  ;;  %v367_v4 = vmul.f32 %v366_v1, %v362_v0  ;;  %v370_v9 = vmul.f32 %v366_v1, %v365_v8 }
 0x131   : > { %v377_v5 = vsel %vm345_vm1, %v369_v2, 0.0  ;;  %v374_v6 = vsel %vm345_vm1, %v368_v3, 0.0  ;;  %v371_v7 = vsel %vm345_vm1, %v367_v4, 0.0  ;;  %v380_v10 = vsel %vm345_vm1, %v370_v9, 0.0 }
 0x132   : > { %378 = vadd.xlane.f32.xlu0 %v377_v5  ;;  %375 = vadd.xlane.f32.xlu1 %v374_v6 }
 0x133   : > { %372 = vadd.xlane.f32.xlu2 %v371_v7 }
 0x13b   : > { %381 = vadd.xlane.f32.xlu2 %v380_v10 }
 0x1a5   : > { %v379_v14 = vpop.xlane.xlu0 %378  ;;  %v376_v15 = vpop.xlane.xlu1 %375 }
 0x1a6   : > { %v389_v16 = vadd.f32 %v385_v11, %v379_v14  ;;  %v388_v17 = vadd.f32 %v384_v12, %v376_v15  ;;  %v373_v18 = vpop.xlane.xlu2 %372 }
 0x1a7   : > { %v387_v19 = vadd.f32 %v383_v13, %v373_v18 }
 0x1a8   : > { %393 = vst.msk [vmem:[%s263_s13 + $0x10] sm:$0xff] %vm268_vm0, %v389_v16 }
 0x1a9   : > { %392 = vst.msk [vmem:[%s263_s13 + $0x8] sm:$0xff] %vm268_vm0, %v388_v17 }
 0x1aa   : > { %391 = vst.msk [vmem:[%s263_s13] sm:$0xff] %vm268_vm0, %v387_v19 }
 0x1ae   : > { %v382_v21 = vpop.xlane.xlu2 %381 }
 0x1af   : > { %v390_v22 = vadd.f32 %v386_v20, %v382_v21 }
 0x1b1   : > { %394 = vst.msk [vmem:[%s263_s13 + $0x18] sm:$0xff] %vm268_vm0, %v390_v22 }
 0x1b2 PF: > { %s18_s23 = sadd.s32 1, %s630_s23   ;;  %s821_s18 = smov %s614_s19 }
 0x1b3   : > { %p15_p0 = scmp.ge.s32.totalorder %s18_s23, 4   ;;  %s822_s19 = smov %s618_s20 }
 0x1b4   : > { %s823_s20 = smov %s715_s30  ;;  %s824_s21 = smov %s626_s22 }
 0x1b5   : > { %s825_s22 = smov %s827_s25  ;;  %17 = sbr.rel (!%p15_p0) target bundleno = 4 (0x4), region = 88 }
 0x1ba   :  { %416 = vsyncpa [#allocation4], 1 }
 0x1bb   :  { %418 = vsyncpa [#allocation4 + $0x1], 1 }

</bundles_post_ra>
